<compile_context>
chip_gen: v7x
topology: tpu7x:2x2x1
jax: 0.10.0
libtpu: 0.0.40
codegen_flags: <defaults>
</compile_context>

<pallas_src>
import functools

import jax
import jax.numpy as jnp
from jax.experimental import pallas as pl
from jax.experimental.pallas import tpu as pltpu

_LANES = 128
_FIELDS = 4                               # 3 direction logits + 1 movement value
_SAMPLES_PER_ROW = _LANES // _FIELDS      # 32 samples per packed row
_MAX_TILE_ROWS = 4096                     # 4096*128*4B = 2 MiB / input / buffer
_MIN_SPLIT_ROWS = 1024                    # only split for v7x megacore once each
                                          # TensorCore gets >= 512 rows of work


def _cdiv(a, b):
    return -(-a // b)


def _round_up(a, m):
    return _cdiv(a, m) * m


def _directional_loss_kernel(pred_ref, target_ref, out_ref, *,
                             alpha, beta, valid_rows):
    """One batch tile: emit alpha*sum(CE_i) + beta*sum(SE_i) for this tile."""
    step = pl.program_id(0)

    x = pred_ref[...].astype(jnp.float32)      # [TB, 128]  (32 samples / row)
    t = target_ref[...].astype(jnp.float32)    # [TB, 128]
    tb, n = x.shape

    # (1, 128) lane masks -- broadcast over the sublane axis instead of
    # re-materializing full-tile iotas / compares every grid step.
    lane = jax.lax.broadcasted_iota(jnp.int32, (1, n), 1)
    field = lane & 3                           # 0,1,2: direction logits, 3: movement
    dir_mask = field < 3
    sel1 = (lane & 1) == 0
    sel2 = (lane & 2) == 0

    # (TB, 1) row-validity mask: the last grid block may be partial; rows past
    # `valid_rows` contain unspecified data and must not reach the sums.
    row = jax.lax.broadcasted_iota(jnp.int32, (tb, 1), 0)
    row_valid = row < (valid_rows - step * tb)

    def group_combine(v, op):
        # Reduce-and-broadcast over aligned 4-lane groups (= one sample each)
        # using two roll+select butterfly steps (stays on the XLU slot).
        nbr1 = jnp.where(sel1, pltpu.roll(v, shift=n - 1, axis=1),   # v[:, i+1]
                         pltpu.roll(v, shift=1, axis=1))             # v[:, i-1]
        y = op(v, nbr1)
        nbr2 = jnp.where(sel2, pltpu.roll(y, shift=n - 2, axis=1),   # y[:, i+2]
                         pltpu.roll(y, shift=2, axis=1))             # y[:, i-2]
        return op(y, nbr2)

    # Per-sample log-sum-exp over the 3 direction lanes.  The movement lane is
    # masked with float32 min BEFORE exp so it underflows to exactly 0 in the
    # softmax denominator whenever any real logit is finite.
    neg_big = jnp.finfo(jnp.float32).min
    masked = jnp.where(dir_mask, x, neg_big)
    m = group_combine(masked, jnp.maximum)          # per-sample max, broadcast
    e = jnp.exp(masked - m)
    lse = m + jnp.log(group_combine(e, jnp.add))    # per-sample lse, broadcast

    # CE_i = -sum_j t_ij * (x_ij - lse_i); SE_i = (x_i3 - t_i3)^2.
    keep_dir = jnp.logical_and(row_valid, dir_mask)
    keep_mov = jnp.logical_and(row_valid, jnp.logical_not(dir_mask))
    ce_sum = jnp.sum(jnp.where(keep_dir, t * (lse - x), 0.0))
    d = x - t
    se_sum = jnp.sum(jnp.where(keep_mov, d * d, 0.0))

    partial = alpha * ce_sum + beta * se_sum
    # Lane-aligned (1, 8, 128) partial-sum block; wrapper reads [:, 0, 0].
    out_ref[...] = jnp.full(out_ref.shape, partial, jnp.float32)


def directional_loss(pred, target, current_price=None, *, alpha=0.5, beta=0.5,
                     max_tile_rows=_MAX_TILE_ROWS,
                     min_split_rows=_MIN_SPLIT_ROWS):
    """Pallas equivalent of DirectionalLoss.forward (current_price is unused,
    matching the PyTorch module)."""
    B, F = pred.shape
    assert F == _FIELDS, "pred must be [B, 4]"

    # --- normalize target to [B, 4] = (direction target, movement target) ---
    if target.ndim == 2 and target.shape[1] == 4:
        target4 = target                                   # no copy
    elif target.ndim == 2 and target.shape[1] == 3:
        # Module's else-branch: movement target is zero.
        target4 = jnp.pad(target, ((0, 0), (0, 1)))
    else:
        raise ValueError(f"unsupported target shape {target.shape}")

    # --- lane-dense packing: row-major flatten -> [rows, 128] ---------------
    # rows = ceil(B / 32): zero-copy reshape when B % 32 == 0, otherwise only a
    # minimal (<128-element) zero pad.  No padding out to the tile grid -- the
    # ragged last grid block is masked in-kernel instead.
    rows = max(1, _cdiv(B, _SAMPLES_PER_ROW))
    packed_elems = rows * _LANES

    def pack(a):
        flat = a.reshape(-1)                 # contiguous row-major: free
        pad = packed_elems - flat.shape[0]
        if pad:
            flat = jnp.pad(flat, (0, pad))   # zero samples contribute 0 to both sums
        return flat.reshape(rows, _LANES)

    pred_p = pack(pred)          # kernel upcasts; bf16 inputs stream as bf16
    tgt_p = pack(target4)

    # --- grid sizing ---------------------------------------------------------
    num_tiles = _cdiv(rows, max_tile_rows)
    if num_tiles == 1 and rows >= 2 * min_split_rows:
        num_tiles = 2            # v7x: give each TensorCore a partial sum
    if num_tiles > 1:
        tile_rows = _round_up(_cdiv(rows, num_tiles), 8)
        num_tiles = _cdiv(rows, tile_rows)
    if num_tiles == 1:
        tile_rows = rows         # single full-array block (any row count OK)

    kernel = functools.partial(
        _directional_loss_kernel,
        alpha=float(alpha), beta=float(beta), valid_rows=rows)

    partials = pl.pallas_call(
        kernel,
        out_shape=jax.ShapeDtypeStruct((num_tiles, 8, _LANES), jnp.float32),
        grid_spec=pltpu.PrefetchScalarGridSpec(
            num_scalar_prefetch=0,
            grid=(num_tiles,),
            in_specs=[pl.BlockSpec((tile_rows, _LANES), lambda i: (i, 0)),
                      pl.BlockSpec((tile_rows, _LANES), lambda i: (i, 0))],
            out_specs=pl.BlockSpec((1, 8, _LANES), lambda i: (i, 0, 0))),
        compiler_params=pltpu.CompilerParams(
            # Independent per-tile partial sums -> batch axis is "parallel" so
            # v7x can shard tiles across both TensorCores.
            dimension_semantics=("parallel",),
            vmem_limit_bytes=32 * 1024 * 1024),
    )(pred_p, tgt_p)

    # Tiny cross-tile reduction + the 1/B mean in plain XLA.
    return jnp.sum(partials[:, 0, 0]) / jnp.float32(B)


def _reference(pred, target4, alpha=0.5, beta=0.5):
    logits = pred[:, :3].astype(jnp.float32)
    logp = jax.nn.log_softmax(logits, axis=-1)
    ce = jnp.mean(-jnp.sum(target4[:, :3].astype(jnp.float32) * logp, axis=-1))
    mse = jnp.mean((pred[:, 3].astype(jnp.float32)
                    - target4[:, 3].astype(jnp.float32)) ** 2)
    return alpha * ce + beta * mse


if __name__ == "__main__":
    key = jax.random.PRNGKey(0)
    k1, k2, k3, k4, k5, k6, k7, k8 = jax.random.split(key, 8)

    # Case 1: [B, 4] target (direction probabilities + true movement).
    B = 8
    pred = jax.random.normal(k1, (B, 4), jnp.float32)
    dir_probs = jax.nn.softmax(jax.random.normal(k2, (B, 3), jnp.float32), axis=-1)
    movement = jax.random.normal(k3, (B, 1), jnp.float32)
    target = jnp.concatenate([dir_probs, movement], axis=1)            # [B, 4]
    current_price = jax.random.uniform(k4, (B,), jnp.float32) * 100.0  # unused

    loss = jax.block_until_ready(directional_loss(pred, target, current_price))
    ref = _reference(pred, target)
    assert jnp.allclose(loss, ref, atol=1e-5, rtol=1e-5), (loss, ref)

    # Case 2: [B, 3] probability target (module's else-branch: movement target
    # 0), with B not a multiple of 32 to exercise the minimal tail padding.
    B2 = 37
    pred2 = jax.random.normal(k5, (B2, 4), jnp.float32)
    tgt3 = jax.nn.softmax(pred2[:, :3] * 0.3, axis=-1)
    loss2 = jax.block_until_ready(directional_loss(pred2, tgt3, None))
    ref2 = _reference(pred2, jnp.concatenate(
        [tgt3, jnp.zeros((B2, 1), jnp.float32)], axis=1))
    assert jnp.allclose(loss2, ref2, atol=1e-5, rtol=1e-5), (loss2, ref2)

    # Case 3: force a multi-tile grid with a ragged last block (small
    # max_tile_rows) to exercise the parallel partial sums + in-kernel
    # row-validity masking used for large batches.
    B3 = 270                       # rows = 9 -> 2 tiles of 8 rows, last partial
    pred3 = jax.random.normal(k6, (B3, 4), jnp.float32)
    dir3 = jax.nn.softmax(jax.random.normal(k7, (B3, 3), jnp.float32), axis=-1)
    mov3 = jax.random.normal(k8, (B3, 1), jnp.float32)
    tgt4 = jnp.concatenate([dir3, mov3], axis=1)
    loss3 = jax.block_until_ready(
        directional_loss(pred3, tgt4, None, max_tile_rows=8))
    ref3 = _reference(pred3, tgt4)
    assert jnp.allclose(loss3, ref3, atol=1e-5, rtol=1e-5), (loss3, ref3)

    print("KERNEL_OK")
</pallas_src>

<mosaic_0001>
module attributes {stable_mosaic.version = 11 : i64} {
  func.func @_directional_loss_kernel(%arg0: i32, %arg1: memref<1x128xf32, #tpu.memory_space<vmem>>, %arg2: memref<1x128xf32, #tpu.memory_space<vmem>>, %arg3: memref<1x8x128xf32, #tpu.memory_space<vmem>>) attributes {dimension_semantics = [#tpu.dimension_semantics<parallel>], iteration_bounds = array<i64: 1>, scalar_prefetch = 0 : i64, scratch_operands = 0 : i64, tpu.core_type = #tpu.core_type<tc>, window_params = [{transform_indices = @transform_0, window_bounds = array<i64: 1, 128>}, {transform_indices = @transform_1, window_bounds = array<i64: 1, 128>}, {transform_indices = @transform_2, window_bounds = array<i64: 1, 8, 128>}]} {
    %c0 = arith.constant 0 : index
    %c0_0 = arith.constant 0 : index
    %0 = vector.load %arg1[%c0, %c0_0] : memref<1x128xf32, #tpu.memory_space<vmem>>, vector<1x128xf32>
    %c0_1 = arith.constant 0 : index
    %c0_2 = arith.constant 0 : index
    %1 = vector.load %arg2[%c0_1, %c0_2] : memref<1x128xf32, #tpu.memory_space<vmem>>, vector<1x128xf32>
    %2 = tpu.iota {dimensions = array<i32: 1>} : vector<1x128xi32>
    %c3_i32 = arith.constant 3 : i32
    %3 = vector.broadcast %c3_i32 : i32 to vector<1x128xi32>
    %4 = arith.andi %2, %3 : vector<1x128xi32>
    %c3_i32_3 = arith.constant 3 : i32
    %5 = vector.broadcast %c3_i32_3 : i32 to vector<1x128xi32>
    %6 = arith.cmpi slt, %4, %5 : vector<1x128xi32>
    %c1_i32 = arith.constant 1 : i32
    %7 = vector.broadcast %c1_i32 : i32 to vector<1x128xi32>
    %8 = arith.andi %2, %7 : vector<1x128xi32>
    %c0_i32 = arith.constant 0 : i32
    %9 = vector.broadcast %c0_i32 : i32 to vector<1x128xi32>
    %10 = arith.cmpi eq, %8, %9 : vector<1x128xi32>
    %c2_i32 = arith.constant 2 : i32
    %11 = vector.broadcast %c2_i32 : i32 to vector<1x128xi32>
    %12 = arith.andi %2, %11 : vector<1x128xi32>
    %c0_i32_4 = arith.constant 0 : i32
    %13 = vector.broadcast %c0_i32_4 : i32 to vector<1x128xi32>
    %14 = arith.cmpi eq, %12, %13 : vector<1x128xi32>
    %15 = tpu.iota {dimensions = array<i32: 0>} : vector<1x1xi32>
    %c1_i32_5 = arith.constant 1 : i32
    %16 = arith.muli %arg0, %c1_i32_5 : i32
    %c1_i32_6 = arith.constant 1 : i32
    %17 = arith.subi %c1_i32_6, %16 : i32
    %18 = vector.broadcast %17 : i32 to vector<1x1xi32>
    %19 = arith.cmpi slt, %15, %18 : vector<1x1xi32>
    %cst = arith.constant -3.40282347E+38 : f32
    %20 = vector.broadcast %cst : f32 to vector<1x128xf32>
    %21 = arith.select %6, %0, %20 : vector<1x128xi1>, vector<1x128xf32>
    %c127_i32 = arith.constant 127 : i32
    %22 = tpu.dynamic_rotate %21 by %c127_i32 dim 1 : vector<1x128xf32>, i32 -> vector<1x128xf32>
    %c1_i32_7 = arith.constant 1 : i32
    %23 = tpu.dynamic_rotate %21 by %c1_i32_7 dim 1 : vector<1x128xf32>, i32 -> vector<1x128xf32>
    %24 = arith.select %10, %22, %23 : vector<1x128xi1>, vector<1x128xf32>
    %25 = arith.maximumf %21, %24 : vector<1x128xf32>
    %c126_i32 = arith.constant 126 : i32
    %26 = tpu.dynamic_rotate %25 by %c126_i32 dim 1 : vector<1x128xf32>, i32 -> vector<1x128xf32>
    %c2_i32_8 = arith.constant 2 : i32
    %27 = tpu.dynamic_rotate %25 by %c2_i32_8 dim 1 : vector<1x128xf32>, i32 -> vector<1x128xf32>
    %28 = arith.select %14, %26, %27 : vector<1x128xi1>, vector<1x128xf32>
    %29 = arith.maximumf %25, %28 : vector<1x128xf32>
    %30 = arith.subf %21, %29 : vector<1x128xf32>
    %31 = math.exp %30 : vector<1x128xf32>
    %c127_i32_9 = arith.constant 127 : i32
    %32 = tpu.dynamic_rotate %31 by %c127_i32_9 dim 1 : vector<1x128xf32>, i32 -> vector<1x128xf32>
    %c1_i32_10 = arith.constant 1 : i32
    %33 = tpu.dynamic_rotate %31 by %c1_i32_10 dim 1 : vector<1x128xf32>, i32 -> vector<1x128xf32>
    %34 = arith.select %10, %32, %33 : vector<1x128xi1>, vector<1x128xf32>
    %35 = arith.addf %31, %34 : vector<1x128xf32>
    %c126_i32_11 = arith.constant 126 : i32
    %36 = tpu.dynamic_rotate %35 by %c126_i32_11 dim 1 : vector<1x128xf32>, i32 -> vector<1x128xf32>
    %c2_i32_12 = arith.constant 2 : i32
    %37 = tpu.dynamic_rotate %35 by %c2_i32_12 dim 1 : vector<1x128xf32>, i32 -> vector<1x128xf32>
    %38 = arith.select %14, %36, %37 : vector<1x128xi1>, vector<1x128xf32>
    %39 = arith.addf %35, %38 : vector<1x128xf32>
    %40 = math.log %39 : vector<1x128xf32>
    %41 = arith.addf %29, %40 : vector<1x128xf32>
    %42 = vector.broadcast %19 : vector<1x1xi1> to vector<1x128xi1>
    %43 = arith.andi %42, %6 : vector<1x128xi1>
    %cst_13 = arith.constant dense<true> : vector<1x128xi1>
    %44 = arith.xori %6, %cst_13 : vector<1x128xi1>
    %45 = vector.broadcast %19 : vector<1x1xi1> to vector<1x128xi1>
    %46 = arith.andi %45, %44 : vector<1x128xi1>
    %47 = arith.subf %41, %0 : vector<1x128xf32>
    %48 = arith.mulf %1, %47 : vector<1x128xf32>
    %cst_14 = arith.constant 0.000000e+00 : f32
    %49 = vector.broadcast %cst_14 : f32 to vector<1x128xf32>
    %50 = arith.select %43, %48, %49 : vector<1x128xi1>, vector<1x128xf32>
    %51 = vector.shape_cast %50 : vector<1x128xf32> to vector<1x1x128xf32>
    %cst_15 = arith.constant dense<0.000000e+00> : vector<1xf32>
    %52 = vector.multi_reduction <add>, %51, %cst_15 [1, 2] : vector<1x1x128xf32> to vector<1xf32>
    %53 = vector.shape_cast %52 : vector<1xf32> to vector<1x1x1xf32>
    %54 = vector.extract %53[0, 0, 0] : f32 from vector<1x1x1xf32>
    %55 = arith.subf %0, %1 : vector<1x128xf32>
    %56 = arith.mulf %55, %55 : vector<1x128xf32>
    %cst_16 = arith.constant 0.000000e+00 : f32
    %57 = vector.broadcast %cst_16 : f32 to vector<1x128xf32>
    %58 = arith.select %46, %56, %57 : vector<1x128xi1>, vector<1x128xf32>
    %59 = vector.shape_cast %58 : vector<1x128xf32> to vector<1x1x128xf32>
    %cst_17 = arith.constant dense<0.000000e+00> : vector<1xf32>
    %60 = vector.multi_reduction <add>, %59, %cst_17 [1, 2] : vector<1x1x128xf32> to vector<1xf32>
    %61 = vector.shape_cast %60 : vector<1xf32> to vector<1x1x1xf32>
    %62 = vector.extract %61[0, 0, 0] : f32 from vector<1x1x1xf32>
    %cst_18 = arith.constant 5.000000e-01 : f32
    %63 = arith.mulf %cst_18, %54 : f32
    %cst_19 = arith.constant 5.000000e-01 : f32
    %64 = arith.mulf %cst_19, %62 : f32
    %65 = arith.addf %63, %64 : f32
    %66 = vector.broadcast %65 : f32 to vector<1x8x128xf32>
    %c0_20 = arith.constant 0 : index
    %c0_21 = arith.constant 0 : index
    %c0_22 = arith.constant 0 : index
    %67 = vector.load %arg3[%c0_20, %c0_21, %c0_22] : memref<1x8x128xf32, #tpu.memory_space<vmem>>, vector<1x8x128xf32>
    tpu.vector_store %arg3[%c0_20, %c0_21, %c0_22], %66 {strides = array<i32>} : memref<1x8x128xf32, #tpu.memory_space<vmem>>, vector<1x8x128xf32>,
    return
  }
  func.func @transform_0(%arg0: i32) -> (i32, i32) {
    %c0_i32 = arith.constant 0 : i32
    %c0_i32_0 = arith.constant 0 : i32
    return %arg0, %c0_i32 : i32, i32
  }
  func.func @transform_1(%arg0: i32) -> (i32, i32) {
    %c0_i32 = arith.constant 0 : i32
    %c0_i32_0 = arith.constant 0 : i32
    return %arg0, %c0_i32 : i32, i32
  }
  func.func @transform_2(%arg0: i32) -> (i32, i32, i32) {
    %c0_i32 = arith.constant 0 : i32
    %c0_i32_0 = arith.constant 0 : i32
    %c0_i32_1 = arith.constant 0 : i32
    return %arg0, %c0_i32, %c0_i32_0 : i32, i32, i32
  }
}

</mosaic_0001>

<bundles_post_ra>
// kernel: tpu_custom_call.1
= control target key start
LH: loop header
LB: loop body
LE: loop exit
PB: predicated region body
PF: predicated region fallthrough
CT: control target
= control target key end

     0   :  { %7 = vsyncpa [#allocation3], 0  ;;  %s264_s0 = inlined_call_operand.hbm [shape: f32[1,128], index: 0, kind: input, shape index: {}]   ;;  %s265_s1 = inlined_call_operand.vmem [shape: f32[1,128], index: 1, kind: input, shape index: {}]   ;;  %s266_s2 = inlined_call_operand.hbm [shape: f32[1,8,128], index: 2, kind: output, shape index: {}]  }
   0x1   :  { %8 = vsyncpa [#allocation4], 0  ;;  %s185_s9 = smov [#allocation2]   ;;  %s137_s13 = scalar_lea.hbm %s264_s0, 16 }
   0x2   :  { %s15_s10 = sshll.u32 %s185_s9, 4  ;;  %p138_p0 = scmp.ne.s32.totalorder %s264_s0, %s137_s13  ;;  %s16_s10 = int_to_ptr.vmem [resolvable:$true] %s15_s10 }
   0x3   :  { %p141_p1 = scmp.lt.u32.totalorder %s137_s13, %s264_s0 }
   0x5   :  { %p143_p2 = pnand %p141_p1, %p138_p0 }
   0x7   :  { %146 = shalt.err (!%p143_p2)
}
   0x8   :  { %s147_s18 = scalar_lea.vmem %s16_s10, 16  ;;  %s151_s19 = scalar_lea.vmem %s16_s10, 32 }
   0x9   :  { %p148_p3 = scmp.ne.s32.totalorder %s16_s10, %s147_s18  ;;  %p152_p4 = scmp.lt.s32.totalorder %s16_s10, %s16_s10 }
   0xa   :  { %p153_p5 = scmp.lt.s32.totalorder %s151_s19, %s147_s18 }
   0xc   :  { %p154_p6 = por %p153_p5, %p152_p4 }
   0xe   :  { %p155_p7 = pnand %p154_p6, %p148_p3 }
  0x10   :  { %158 = shalt.err (!%p155_p7)
}
  0x11   :  { %18 = dma.hbm_to_vmem [thread:$0]  %s264_s0, 16, %s16_s10, [#allocation3]  }
  0x12   :  { %181 = dma.done.wait [#allocation3], 16  }
  0x13   :  { %182 = vsyncadd [#allocation3], 4294967280  ;;  %v26_v0 = vlaneseq  ;;  %v24_v4 = vld [vmem:[#allocation2] sm:$0x1]  ;;  %s186_s22 = smov 127   ;;  %s187_s23 = smov 1  }
  0x14   :  { %s188_s0 = smov 126   ;;  %s189_s24 = smov 2   ;;  %v25_v25 = vld [vmem:[%s265_s1] sm:$0x1]  ;;  %vm190_vm4 = vmmov 1   ;;  %vm78_vm7 = vcmask 1040384  }
  0x15   :  { %v27_v1 = vand.u32 127, %v26_v0  ;;  %v35_v26 = vshrl.u32 %v26_v0, 7  ;;  %v89_v27 = vsub.f32 %v24_v4, %v25_v25  ;;  %s191_s30 = smov [#allocation5]  }
  0x16   :  { %s113_s3 = sshll.u32 %s191_s30, 4  ;;  %s114_s3 = int_to_ptr.vmem [resolvable:$true] %s113_s3 }
  0x17   :  { %v28_v2 = vand.u32 3, %v27_v1  ;;  %v30_v6 = vand.u32 1, %v27_v1  ;;  %v32_v12 = vand.u32 2, %v27_v1  ;;  %vm38_vm3 = vcmp.lt.s32.totalorder %v35_v26, 1  ;;  %s159_s5 = scalar_lea.vmem %s114_s3, 128  ;;  %p164_p9 = scmp.lt.s32.totalorder %s114_s3, %s114_s3 }
  0x18   :  { %v90_v28 = vmul.f32 %v89_v27, %v89_v27  ;;  %p160_p8 = scmp.ne.s32.totalorder %s114_s3, %s159_s5  ;;  %p165_p10 = scmp.lt.s32.totalorder %s159_s5, %s159_s5 }
  0x19   :  { %vm219_vm0 = vcmp.lt.s32.totalorder %v28_v2, 3  ;;  %vm225_vm1 = vcmp.eq.s32.totalorder %v30_v6, 0  ;;  %vm231_vm2 = vcmp.eq.s32.totalorder %v32_v12, 0 }
  0x1a   :  { %v39_v5 = vsel %vm219_vm0, %v24_v4, -3.4028235e+38  ;;  %vm73_vm5 = vmxor %vm219_vm0, %vm190_vm4  ;;  %p166_p11 = por %p165_p10, %p164_p9 }
  0x1b   :  { %40 = vrot.lane.b32.xlu0 %v39_v5, %s186_s22  ;;  %vm74_vm6 = vmand %vm38_vm3, %vm73_vm5 }
  0x1c   :  { %v91_v29 = vsel %vm74_vm6, %v90_v28, 0.0  ;;  %vm72_vm8 = vmand %vm38_vm3, %vm219_vm0  ;;  %p167_p12 = pnand %p166_p11, %p160_p8 }
  0x1d   :  { %v92_v30 = vsel %vm78_vm7, %v91_v29, 0.0 }
  0x1f   :  { %42 = vrot.lane.b32.xlu0 %v39_v5, %s187_s23 }
  0x8d   :  { %v41_v7 = vpop.permute.xlu0 %40 }
  0x91   :  { %v43_v9 = vpop.permute.xlu0 %42 }
  0x92   :  { %v44_v10 = vsel %vm225_vm1, %v41_v7, %v43_v9 }
  0x93   :  { %v45_v11 = vmax.f32 %v39_v5, %v44_v10 }
  0x95   :  { %46 = vrot.lane.b32.xlu1 %v45_v11, %s188_s0 }
  0x99   :  { %48 = vrot.lane.b32.xlu1 %v45_v11, %s189_s24 }
 0x107   :  { %v47_v13 = vpop.permute.xlu1 %46 }
 0x10b   :  { %v49_v15 = vpop.permute.xlu1 %48 }
 0x10c   :  { %v50_v16 = vsel %vm231_vm2, %v47_v13, %v49_v15 }
 0x10d   :  { %v51_v17 = vmax.f32 %v45_v11, %v50_v16 }
 0x10f   :  { %v52_v18 = vsub.f32 %v39_v5, %v51_v17 }
 0x111   :  { %v53_v19 = vmul.f32 1.442695, %v52_v18 }
 0x113   :  { %133 = vpow2.f32 %v53_v19 }
 0x11d   :  { %v134_v20 = vpop.eup %133 }
 0x11e   :  { %57 = vrot.lane.b32.xlu1 %v134_v20, %s187_s23  ;;  %55 = vrot.lane.b32.xlu0 %v134_v20, %s186_s22 }
 0x190   :  { %v58_v21 = vpop.permute.xlu1 %57  ;;  %v56_v22 = vpop.permute.xlu0 %55 }
 0x191   :  { %v59_v23 = vsel %vm225_vm1, %v56_v22, %v58_v21 }
 0x192   :  { %v60_v24 = vadd.f32 %v134_v20, %v59_v23 }
 0x194   :  { %63 = vrot.lane.b32.xlu1 %v60_v24, %s189_s24  ;;  %61 = vrot.lane.b32.xlu0 %v60_v24, %s188_s0 }
 0x1b8   :  { %93 = vadd.xlane.f32.xlu1 %v92_v30 }
 0x206   :  { %v64_v31 = vpop.permute.xlu1 %63  ;;  %v62_v32 = vpop.permute.xlu0 %61 }
 0x207   :  { %v65_v33 = vsel %vm231_vm2, %v62_v32, %v64_v31 }
 0x208   :  { %v66_v34 = vadd.f32 %v65_v33, %v60_v24 }
 0x20a   :  { %135 = vlog2.f32 %v66_v34 }
 0x214   :  { %v136_v35 = vpop.eup %135 }
 0x215   :  { %v68_v36 = vmul.f32 0.6931472, %v136_v35 }
 0x217   :  { %v69_v37 = vadd.f32 %v68_v36, %v51_v17 }
 0x219   :  { %v75_v38 = vsub.f32 %v69_v37, %v24_v4 }
 0x21b   :  { %v76_v39 = vmul.f32 %v75_v38, %v25_v25 }
 0x21d   :  { %v77_v40 = vsel %vm72_vm8, %v76_v39, 0.0 }
 0x21e   :  { %v79_v41 = vsel %vm78_vm7, %v77_v40, 0.0 }
 0x21f   :  { %80 = vadd.xlane.f32.xlu0 %v79_v41 }
 0x245   :  { %v94_v42 = vpop.xlane.xlu1 %93 }
 0x246   :  { %v95_v43 = vrot.slane %v94_v42, 4 }
 0x248   :  { %v96_v44 = vadd.f32 %v95_v43, %v94_v42 }
 0x24a   :  { %v97_v45 = vrot.slane %v96_v44, 2 }
 0x24c   :  { %v98_v49 = vadd.f32 %v97_v45, %v96_v44 }
 0x24e   :  { %v99_v52 = vrot.slane %v98_v49, 1 }
 0x250   :  { %v100_v55 = vadd.f32 %v99_v52, %v98_v49 }
 0x2ac   :  { %v81_v46 = vpop.xlane.xlu0 %80 }
 0x2ad   :  { %v82_v47 = vrot.slane %v81_v46, 4 }
 0x2af   :  { %v83_v48 = vadd.f32 %v82_v47, %v81_v46 }
 0x2b1   :  { %v84_v50 = vrot.slane %v83_v48, 2 }
 0x2b3   :  { %v85_v51 = vadd.f32 %v84_v50, %v83_v48 }
 0x2b5   :  { %v86_v53 = vrot.slane %v85_v51, 1 }
 0x2b7   :  { %v87_v54 = vadd.f32 %v86_v53, %v85_v51 }
 0x2b9   :  { %122 = vpush %v87_v54 }
 0x2ba   :  { %124 = vpush %v100_v55 }
 0x2ea   :  { %s123_s1 = spop %122 }
 0x2eb   :  { %s102_s27 = smul.f32 0.5, %s123_s1  ;;  %s125_s28 = spop %124 }
 0x2ec   :  { %s103_s29 = smul.f32 0.5, %s125_s28 }
 0x2ee   :  { %s104_s4 = sadd.f32 %s103_s29, %s102_s27 }
 0x2f0   :  { %v105_v56 = vstv %s104_s4 }
 0x2f1   :  { %106 = vst [vmem:[#allocation5] sm:$0xff] %v105_v56 }
 0x2f2   :  { %170 = shalt.err (!%p167_p12)
}
 0x2f3   :  { %s171_s8 = scalar_lea.hbm %s266_s2, 128 }
 0x2f4   :  { %p172_p13 = scmp.ne.s32.totalorder %s266_s2, %s171_s8  ;;  %p175_p0 = scmp.lt.u32.totalorder %s171_s8, %s266_s2 }
 0x2f6   :  { %p177_p1 = pnand %p175_p0, %p172_p13 }
 0x2f8   :  { %180 = shalt.err (!%p177_p1)
}
 0x2f9   :  { %116 = dma.vmem_to_hbm [thread:$0]  %s114_s3, 128, %s266_s2, [#allocation4]  }
 0x2fa   :  { %183 = dma.done.wait [#allocation4], 128  }
 0x2fb   :  { %184 = vsyncadd [#allocation4], 4294967168 }
 0x2fc   :  { %120 = vsyncpa [#allocation3], 1 }
 0x2fd   :  { %121 = vsyncpa [#allocation4], 1 }

</bundles_post_ra>
